<compile_context>
chip_gen: v7x
topology: tpu7x:2x2x1
jax: 0.10.0
libtpu: 0.0.40
codegen_flags: <defaults>
</compile_context>

<pallas_src>
import jax
import jax.numpy as jnp
from jax import lax
from jax.experimental import pallas as pl
from jax.experimental.pallas import tpu as pltpu


def attention_kernel(x1_ref, x2_ref, wt_ref, o_ref, wx1_ref):
    """One (batch, row-tile, col-tile) grid step of att = (x1 @ W.T) @ x2^T."""
    # wx1 depends only on (batch, row-tile): compute it on the first N2 tile
    # and keep it in VMEM scratch for the remaining N2 tiles.
    @pl.when(pl.program_id(2) == 0)
    def _():
        wx1 = jnp.dot(x1_ref[...], wt_ref[...],
                      preferred_element_type=jnp.float32)         # (TM, H) f32
        wx1_ref[...] = wx1.astype(wx1_ref.dtype)                  # -> bf16

    # (TM, H) x (TN, H) -> (TM, TN): contract the hidden dims directly
    # (same pattern as flash attention's q @ k^T -> MXU trans-B path).
    dn = (((1,), (1,)), ((), ()))
    att = lax.dot_general(wx1_ref[...], x2_ref[...], dn,
                          preferred_element_type=jnp.float32)     # (TM, TN) f32
    o_ref[...] = att.astype(o_ref.dtype)


def _pick_block_m(n1):
    if n1 <= 256:
        return n1                      # full rows (full-dim block is always legal)
    for cand in (256, 512, 128):       # 256 fills a 256x256 MXU pass on v6e/v7x
        if n1 % cand == 0:
            return cand
    return 256                         # ragged large N1: pad up to a multiple


def _pick_block_n(n2):
    if n2 <= 1024:
        return n2                      # keep x2 whole when it is small
    for cand in (1024, 512, 256, 128):
        if n2 % cand == 0:
            return cand
    return 512                         # ragged large N2: pad up to a multiple


def _ceil_to(x, m):
    return ((x + m - 1) // m) * m


def _build_call(B, n1p, n2p, H, block_m, block_n, out_dtype, in_dtype,
                single_buffer_weight):
    grid = (B, n1p // block_m, n2p // block_n)

    w_spec_kwargs = {}
    if single_buffer_weight:
        # Constant block index -> a second pipeline buffer buys nothing; keep a
        # single VMEM copy of W (halves its footprint; matters on v7x 64 MiB).
        w_spec_kwargs = dict(pipeline_mode=pl.Buffered(1))

    in_specs = [
        pl.BlockSpec((None, block_m, H), lambda b, m, n: (b, m, 0)),    # x1 tile
        pl.BlockSpec((None, block_n, H), lambda b, m, n: (b, n, 0)),    # x2 tile
        pl.BlockSpec((H, H), lambda b, m, n: (0, 0), **w_spec_kwargs),  # W.T
    ]
    out_specs = pl.BlockSpec((None, block_m, block_n),
                             lambda b, m, n: (b, m, n))

    itm_in = jnp.dtype(in_dtype).itemsize
    itm_out = jnp.dtype(out_dtype).itemsize
    flops = 2 * B * n1p * H * H + 2 * B * n1p * n2p * H
    bytes_accessed = (B * n1p * H * itm_in
                      + B * n2p * H * itm_in * (n1p // block_m)
                      + H * H * itm_in
                      + B * n1p * n2p * itm_out)

    # Adaptive VMEM budget: double-buffered x1 / x2 / out tiles, W copies, and
    # the wx1 scratch, with ~2x headroom; floor at 32 MiB (v7x-safe), cap 100 MiB.
    w_copies = 1 if single_buffer_weight else 2
    vmem_need = (2 * block_m * H * itm_in
                 + 2 * block_n * H * itm_in
                 + w_copies * H * H * itm_in
                 + 2 * block_m * block_n * itm_out
                 + block_m * H * itm_in)
    vmem_limit = int(min(100 * 1024 * 1024, max(32 * 1024 * 1024, 2 * vmem_need)))

    return pl.pallas_call(
        attention_kernel,
        out_shape=jax.ShapeDtypeStruct((B, n1p, n2p), out_dtype),
        grid=grid,
        in_specs=in_specs,
        out_specs=out_specs,
        scratch_shapes=[pltpu.VMEM((block_m, H), in_dtype)],    # wx1 cache
        compiler_params=pltpu.CompilerParams(
            # batch / row-tiles are independent (megacore-parallel); the N2
            # axis reuses the wx1 scratch so it must stay sequential.
            dimension_semantics=("parallel", "parallel", "arbitrary"),
            vmem_limit_bytes=vmem_limit,
        ),
        cost_estimate=pl.CostEstimate(flops=flops, transcendentals=0,
                                      bytes_accessed=bytes_accessed),
    )


def attention_pallas(x1, x2, w_t, *, block_m=None, block_n=None,
                     compute_dtype=jnp.bfloat16, single_buffer_weight=True):
    """x1: (B, N1, H), x2: (B, N2, H), w_t: (H, H) == W.T.  Returns (B, N1, N2)."""
    B, N1, H = x1.shape
    B2, N2, H2 = x2.shape
    assert B == B2 and H == H2 and w_t.shape == (H, H)

    out_dtype = x1.dtype

    if block_m is None:
        block_m = _pick_block_m(N1)
    if block_n is None:
        block_n = _pick_block_n(N2)
    assert block_m == N1 or block_m % 8 == 0, "row tile must be sublane-aligned"
    assert block_n == N2 or block_n % 8 == 0, "col tile must be sublane-aligned"

    # Pad ragged N1 / N2 up to a tile multiple (no silent grid truncation);
    # padded rows / columns are sliced off after the call.
    n1p = _ceil_to(N1, block_m)
    n2p = _ceil_to(N2, block_n)

    # bf16 MXU inputs (single-pass MXU, half the HBM/VMEM bytes); both matmuls
    # still accumulate in f32 inside the kernel.
    x1c = x1.astype(compute_dtype)
    x2c = x2.astype(compute_dtype)
    wtc = w_t.astype(compute_dtype)
    if n1p != N1:
        x1c = jnp.pad(x1c, ((0, 0), (0, n1p - N1), (0, 0)))
    if n2p != N2:
        x2c = jnp.pad(x2c, ((0, 0), (0, n2p - N2), (0, 0)))

    out = None
    last_err = None
    attempts = (True, False) if single_buffer_weight else (False,)
    for use_single_buffer in attempts:
        try:
            call = _build_call(B, n1p, n2p, H, block_m, block_n, out_dtype,
                               compute_dtype, use_single_buffer)
            out = call(x1c, x2c, wtc)
            break
        except Exception as err:  # e.g. pipeline_mode unsupported on this JAX
            last_err = err
    if out is None:
        raise last_err

    if n1p != N1 or n2p != N2:
        out = out[:, :N1, :N2]
    return out


# ----------------------------------------------------------------------------
# Pure-JAX references (same math as the PyTorch module)
# ----------------------------------------------------------------------------
def attention_ref_bf16(x1, x2, w_t):
    """Reference that follows the kernel's bf16-input / f32-accumulate path."""
    x1c, x2c, wc = (a.astype(jnp.bfloat16) for a in (x1, x2, w_t))
    wx1 = jnp.dot(x1c, wc, preferred_element_type=jnp.float32).astype(jnp.bfloat16)
    att = jnp.einsum("bmh,bnh->bmn", wx1, x2c,
                     preferred_element_type=jnp.float32)
    return att.astype(x1.dtype)


def attention_ref_f32(x1, x2, w_t):
    return jnp.einsum("bmh,bnh->bmn", x1 @ w_t, x2)


# ----------------------------------------------------------------------------
if __name__ == "__main__":
    # Small but TPU-friendly shapes: lane-dense and (8,128)-aligned.
    B, N1, N2, H = 2, 128, 128, 128

    key = jax.random.PRNGKey(0)
    k1, k2, kw = jax.random.split(key, 3)
    x1 = jax.random.normal(k1, (B, N1, H), jnp.float32)
    x2 = jax.random.normal(k2, (B, N2, H), jnp.float32)
    # nn.Linear default init: U(-1/sqrt(H), 1/sqrt(H)); stored pre-transposed (W.T).
    bound = H ** -0.5
    w_t = jax.random.uniform(kw, (H, H), jnp.float32, -bound, bound)

    att = attention_pallas(x1, x2, w_t)
    att = jax.block_until_ready(att)

    assert att.shape == (B, N1, N2)
    assert bool(jnp.all(jnp.isfinite(att)))

    # Tight check vs. a reference that uses the same bf16-input / f32-acc path.
    ref_bf16 = attention_ref_bf16(x1, x2, w_t)
    assert bool(jnp.allclose(att, ref_bf16, atol=2e-2, rtol=2e-2))

    # Loose sanity check vs. the full-f32 math of the original module
    # (difference is only bf16 input rounding).
    ref_f32 = attention_ref_f32(x1, x2, w_t)
    assert bool(jnp.allclose(att, ref_f32, atol=3e-1, rtol=5e-2))

    print("KERNEL_OK")
</pallas_src>

<mosaic_0001>
module attributes {stable_mosaic.version = 11 : i64} {
  func.func @attention_kernel(%arg0: i32, %arg1: i32, %arg2: i32, %arg3: memref<1x128x128xbf16, #tpu.memory_space<vmem>>, %arg4: memref<1x128x128xbf16, #tpu.memory_space<vmem>>, %arg5: memref<128x128xbf16, #tpu.memory_space<vmem>>, %arg6: memref<1x128x128xf32, #tpu.memory_space<vmem>>, %arg7: memref<128x128xbf16, #tpu.memory_space<vmem>>) attributes {dimension_semantics = [#tpu.dimension_semantics<parallel>, #tpu.dimension_semantics<parallel>, #tpu.dimension_semantics<arbitrary>], iteration_bounds = array<i64: 2, 1, 1>, scalar_prefetch = 0 : i64, scratch_operands = 1 : i64, tpu.core_type = #tpu.core_type<tc>, window_params = [{transform_indices = @transform_0, window_bounds = array<i64: 1, 128, 128>}, {transform_indices = @transform_1, window_bounds = array<i64: 1, 128, 128>}, {pipeline_mode = #tpu.pipeline_mode<synchronous>, transform_indices = @transform_2, window_bounds = array<i64: 128, 128>}, {transform_indices = @transform_3, window_bounds = array<i64: 1, 128, 128>}]} {
    %c0_i32 = arith.constant 0 : i32
    %0 = arith.cmpi eq, %arg2, %c0_i32 : i32
    %1 = arith.extui %0 : i1 to i32
    %c0_i32_0 = arith.constant 0 : i32
    %2 = arith.cmpi ne, %1, %c0_i32_0 : i32
    scf.if %2 {
      %c0_8 = arith.constant 0 : index
      %c0_9 = arith.constant 0 : index
      %c0_10 = arith.constant 0 : index
      %10 = vector.load %arg3[%c0_8, %c0_9, %c0_10] : memref<1x128x128xbf16, #tpu.memory_space<vmem>>, vector<1x128x128xbf16>
      %11 = vector.shape_cast %10 : vector<1x128x128xbf16> to vector<128x128xbf16>
      %c0_11 = arith.constant 0 : index
      %c0_12 = arith.constant 0 : index
      %12 = vector.load %arg5[%c0_11, %c0_12] : memref<128x128xbf16, #tpu.memory_space<vmem>>, vector<128x128xbf16>
      %cst_13 = arith.constant dense<0.000000e+00> : vector<128x128xf32>
      %13 = tpu.matmul %11, %12, %cst_13 {dimension_numbers = #tpu.dot_dimension_numbers<[1], [0], [0], [1], [0, 0, 1, 1], [], []>} : vector<128x128xbf16>, vector<128x128xbf16>, vector<128x128xf32> -> vector<128x128xf32>
      %14 = arith.truncf %13 : vector<128x128xf32> to vector<128x128xbf16>
      %c0_14 = arith.constant 0 : index
      %c0_15 = arith.constant 0 : index
      %15 = vector.load %arg7[%c0_14, %c0_15] : memref<128x128xbf16, #tpu.memory_space<vmem>>, vector<128x128xbf16>
      tpu.vector_store %arg7[%c0_14, %c0_15], %14 {strides = array<i32>} : memref<128x128xbf16, #tpu.memory_space<vmem>>, vector<128x128xbf16>,
    } else {
    }
    %c0 = arith.constant 0 : index
    %c0_1 = arith.constant 0 : index
    %3 = vector.load %arg7[%c0, %c0_1] : memref<128x128xbf16, #tpu.memory_space<vmem>>, vector<128x128xbf16>
    %c0_2 = arith.constant 0 : index
    %c0_3 = arith.constant 0 : index
    %c0_4 = arith.constant 0 : index
    %4 = vector.load %arg4[%c0_2, %c0_3, %c0_4] : memref<1x128x128xbf16, #tpu.memory_space<vmem>>, vector<1x128x128xbf16>
    %5 = vector.shape_cast %4 : vector<1x128x128xbf16> to vector<128x128xbf16>
    %cst = arith.constant dense<0.000000e+00> : vector<128x128xf32>
    %6 = tpu.matmul %3, %5, %cst {dimension_numbers = #tpu.dot_dimension_numbers<[1], [1], [0], [0], [0, 0, 1, 0], [], []>} : vector<128x128xbf16>, vector<128x128xbf16>, vector<128x128xf32> -> vector<128x128xf32>
    %c0_5 = arith.constant 0 : index
    %c0_6 = arith.constant 0 : index
    %c0_7 = arith.constant 0 : index
    %7 = vector.load %arg6[%c0_5, %c0_6, %c0_7] : memref<1x128x128xf32, #tpu.memory_space<vmem>>, vector<1x128x128xf32>
    %8 = vector.shape_cast %7 : vector<1x128x128xf32> to vector<128x128xf32>
    %9 = vector.shape_cast %6 : vector<128x128xf32> to vector<1x128x128xf32>
    tpu.vector_store %arg6[%c0_5, %c0_6, %c0_7], %9 {strides = array<i32>} : memref<1x128x128xf32, #tpu.memory_space<vmem>>, vector<1x128x128xf32>,
    return
  }
  func.func @transform_0(%arg0: i32, %arg1: i32, %arg2: i32) -> (i32, i32, i32) {
    %c0_i32 = arith.constant 0 : i32
    %c0_i32_0 = arith.constant 0 : i32
    return %arg0, %arg1, %c0_i32 : i32, i32, i32
  }
  func.func @transform_1(%arg0: i32, %arg1: i32, %arg2: i32) -> (i32, i32, i32) {
    %c0_i32 = arith.constant 0 : i32
    %c0_i32_0 = arith.constant 0 : i32
    return %arg0, %arg2, %c0_i32 : i32, i32, i32
  }
  func.func @transform_2(%arg0: i32, %arg1: i32, %arg2: i32) -> (i32, i32) {
    %c0_i32 = arith.constant 0 : i32
    %c0_i32_0 = arith.constant 0 : i32
    %c0_i32_1 = arith.constant 0 : i32
    return %c0_i32, %c0_i32_0 : i32, i32
  }
  func.func @transform_3(%arg0: i32, %arg1: i32, %arg2: i32) -> (i32, i32, i32) {
    %c0_i32 = arith.constant 0 : i32
    return %arg0, %arg1, %arg2 : i32, i32, i32
  }
}

module attributes {stable_mosaic.version = 11 : i64} {
  func.func @attention_kernel(%arg0: i32, %arg1: i32, %arg2: i32, %arg3: memref<1x128x128xbf16, #tpu.memory_space<vmem>>, %arg4: memref<1x128x128xbf16, #tpu.memory_space<vmem>>, %arg5: memref<128x128xbf16, #tpu.memory_space<vmem>>, %arg6: memref<1x128x128xf32, #tpu.memory_space<vmem>>, %arg7: memref<128x128xbf16, #tpu.memory_space<vmem>>) attributes {dimension_semantics = [#tpu.dimension_semantics<parallel>, #tpu.dimension_semantics<parallel>, #tpu.dimension_semantics<arbitrary>], iteration_bounds = array<i64: 2, 1, 1>, scalar_prefetch = 0 : i64, scratch_operands = 1 : i64, tpu.core_type = #tpu.core_type<tc>, window_params = [{transform_indices = @transform_0, window_bounds = array<i64: 1, 128, 128>}, {transform_indices = @transform_1, window_bounds = array<i64: 1, 128, 128>}, {pipeline_mode = #tpu.pipeline_mode<synchronous>, transform_indices = @transform_2, window_bounds = array<i64: 128, 128>}, {transform_indices = @transform_3, window_bounds = array<i64: 1, 128, 128>}]} {
    %c0_i32 = arith.constant 0 : i32
    %0 = arith.cmpi eq, %arg2, %c0_i32 : i32
    %1 = arith.extui %0 : i1 to i32
    %c0_i32_0 = arith.constant 0 : i32
    %2 = arith.cmpi ne, %1, %c0_i32_0 : i32
    scf.if %2 {
      %c0_8 = arith.constant 0 : index
      %c0_9 = arith.constant 0 : index
      %c0_10 = arith.constant 0 : index
      %10 = vector.load %arg3[%c0_8, %c0_9, %c0_10] : memref<1x128x128xbf16, #tpu.memory_space<vmem>>, vector<1x128x128xbf16>
      %11 = vector.shape_cast %10 : vector<1x128x128xbf16> to vector<128x128xbf16>
      %c0_11 = arith.constant 0 : index
      %c0_12 = arith.constant 0 : index
      %12 = vector.load %arg5[%c0_11, %c0_12] : memref<128x128xbf16, #tpu.memory_space<vmem>>, vector<128x128xbf16>
      %cst_13 = arith.constant dense<0.000000e+00> : vector<128x128xf32>
      %13 = tpu.matmul %11, %12, %cst_13 {dimension_numbers = #tpu.dot_dimension_numbers<[1], [0], [0], [1], [0, 0, 1, 1], [], []>} : vector<128x128xbf16>, vector<128x128xbf16>, vector<128x128xf32> -> vector<128x128xf32>
      %14 = arith.truncf %13 : vector<128x128xf32> to vector<128x128xbf16>
      %c0_14 = arith.constant 0 : index
      %c0_15 = arith.constant 0 : index
      %15 = vector.load %arg7[%c0_14, %c0_15] : memref<128x128xbf16, #tpu.memory_space<vmem>>, vector<128x128xbf16>
      tpu.vector_store %arg7[%c0_14, %c0_15], %14 {strides = array<i32>} : memref<128x128xbf16, #tpu.memory_space<vmem>>, vector<128x128xbf16>,
    } else {
    }
    %c0 = arith.constant 0 : index
    %c0_1 = arith.constant 0 : index
    %3 = vector.load %arg7[%c0, %c0_1] : memref<128x128xbf16, #tpu.memory_space<vmem>>, vector<128x128xbf16>
    %c0_2 = arith.constant 0 : index
    %c0_3 = arith.constant 0 : index
    %c0_4 = arith.constant 0 : index
    %4 = vector.load %arg4[%c0_2, %c0_3, %c0_4] : memref<1x128x128xbf16, #tpu.memory_space<vmem>>, vector<1x128x128xbf16>
    %5 = vector.shape_cast %4 : vector<1x128x128xbf16> to vector<128x128xbf16>
    %cst = arith.constant dense<0.000000e+00> : vector<128x128xf32>
    %6 = tpu.matmul %3, %5, %cst {dimension_numbers = #tpu.dot_dimension_numbers<[1], [1], [0], [0], [0, 0, 1, 0], [], []>} : vector<128x128xbf16>, vector<128x128xbf16>, vector<128x128xf32> -> vector<128x128xf32>
    %c0_5 = arith.constant 0 : index
    %c0_6 = arith.constant 0 : index
    %c0_7 = arith.constant 0 : index
    %7 = vector.load %arg6[%c0_5, %c0_6, %c0_7] : memref<1x128x128xf32, #tpu.memory_space<vmem>>, vector<1x128x128xf32>
    %8 = vector.shape_cast %7 : vector<1x128x128xf32> to vector<128x128xf32>
    %9 = vector.shape_cast %6 : vector<128x128xf32> to vector<1x128x128xf32>
    tpu.vector_store %arg6[%c0_5, %c0_6, %c0_7], %9 {strides = array<i32>} : memref<1x128x128xf32, #tpu.memory_space<vmem>>, vector<1x128x128xf32>,
    return
  }
  func.func @transform_0(%arg0: i32, %arg1: i32, %arg2: i32) -> (i32, i32, i32) {
    %c0_i32 = arith.constant 0 : i32
    %c0_i32_0 = arith.constant 0 : i32
    return %arg0, %arg1, %c0_i32 : i32, i32, i32
  }
  func.func @transform_1(%arg0: i32, %arg1: i32, %arg2: i32) -> (i32, i32, i32) {
    %c0_i32 = arith.constant 0 : i32
    %c0_i32_0 = arith.constant 0 : i32
    return %arg0, %arg2, %c0_i32 : i32, i32, i32
  }
  func.func @transform_2(%arg0: i32, %arg1: i32, %arg2: i32) -> (i32, i32) {
    %c0_i32 = arith.constant 0 : i32
    %c0_i32_0 = arith.constant 0 : i32
    %c0_i32_1 = arith.constant 0 : i32
    return %c0_i32, %c0_i32_0 : i32, i32
  }
  func.func @transform_3(%arg0: i32, %arg1: i32, %arg2: i32) -> (i32, i32, i32) {
    %c0_i32 = arith.constant 0 : i32
    return %arg0, %arg1, %arg2 : i32, i32, i32
  }
}

</mosaic_0001>

<bundles_post_ra>
// kernel: tpu_custom_call.1
= control target key start
LH: loop header
LB: loop body
LE: loop exit
PB: predicated region body
PF: predicated region fallthrough
CT: control target
= control target key end

     0   :  { %s1615_s0 = inlined_call_operand.hbm [shape: bf16[2,128,128], index: 0, kind: input, shape index: {}]   ;;  %s1616_s1 = inlined_call_operand.hbm [shape: bf16[2,128,128], index: 1, kind: input, shape index: {}]   ;;  %s1617_s2 = inlined_call_operand.hbm [shape: bf16[128,128], index: 2, kind: input, shape index: {}]   ;;  %s1618_s3 = inlined_call_operand.hbm [shape: f32[2,128,128], index: 3, kind: output, shape index: {}]  }
   0x1   :  { %1626 = sst [smem:[#allocation14_spill]] %s1615_s0 }
   0x2   :  { %1627 = sst [smem:[#allocation15_spill]] %s1617_s2 }
   0x3   :  { %8 = vsyncpa [#allocation4], 0 }
   0x4   :  { %10 = vsyncpa [#allocation4 + $0x1], 0 }
   0x5   :  { %11 = vsyncpa [#allocation7], 0 }
   0x6   :  { %13 = vsyncpa [#allocation7 + $0x1], 0 }
   0x7   :  { %14 = vsyncpa [#allocation5], 0 }
   0x8   :  { %16 = vsyncpa [#allocation5 + $0x1], 0  ;;  %s1309_s12 = smov 0   ;;  %s1311_s13 = smov 0  }
   0x9   :  { %s1313_s14 = smov 0   ;;  %s1315_s15 = smov 0  }
   0xa   :  { %s1317_s16 = smov 0   ;;  %s1319_s17 = smov 0  }
   0xb LB: > { %s1340_s18 = sadd.s32 4294967295, %s1279_s17   ;;  %s852_s19 = sadd.s32 4294967294, %s1279_s17   ;;  %s1279_s17 = sphi %s1319_s17, %s22_s17   ;;  %s1275_s16 = sphi %s1317_s16, %s1650_s16   ;;  %s1271_s15 = sphi %s1315_s15, %s1649_s15   ;;  %s1267_s14 = sphi %s1313_s14, %s1648_s14   ;;  %s1263_s13 = sphi %s1311_s13, %s1647_s13   ;;  %s1259_s12 = sphi %s1309_s12, %s1646_s12  }
   0xc   : > { %p63_p0 = scmp.ne.s32.totalorder %s1263_s13, %s1259_s12  ;;  %p1619_p1 = scmp.eq.s32.totalorder %s1340_s18, 0 }
   0xd   : > { %p146_p3 = scmp.eq.s32.totalorder %s852_s19, 1  ;;  %p853_p5 = scmp.ge.s32.totalorder %s1279_s17, 1 }
   0xe   : > { %p1349_p4 = por %p1619_p1, %p63_p0  ;;  %p153_p7 = scmp.lt.s32.totalorder %s1279_s17, 3 }
   0xf   : > { %p1354_p6 = por %p146_p3, %p63_p0  ;;  %s1281_s23 = smov [#allocation8]  }
  0x10   : > { %s1628_s20 = scalar_select %p1349_p4, 1, 0 }
  0x11   : > { %s1629_s21 = scalar_select %p1354_p6, 1, 0 }
  0x12   : > { %p1359_p8 = pnand %p853_p5, %p153_p7  ;;  %s165_s24 = sshll.u32 %s1281_s23, 4  ;;  %s166_s24 = int_to_ptr.vmem [resolvable:$true] %s165_s24 }
  0x13   : > { %s41_s26 = sadd.s32 1, %s1275_s16  ;;  %s1632_s2 = sld [smem:[#allocation15_spill]] }
  0x14   : > { %s1630_s22 = scalar_select %p1359_p8, 1, 0 }
  0x15   : > { %p1005_p9 = pneg %p1359_p8 }
  0x17   : > { %p1368_p11 = pnand %p1005_p9, %p1619_p1 }
  0x19   : > { %s1101_s29 = scalar_lea.hbm %s1632_s2, 1024  ;;  %p1103_p13 = pneg %p1368_p11 }
  0x1a   : > { %p1102_p12 = scmp.ne.s32.totalorder %s1632_s2, %s1101_s29  ;;  %p1108_p5 = scmp.lt.u32.totalorder %s1101_s29, %s1632_s2 }
  0x1c   : > { %p1104_p0 = pnand %p1103_p13, %p1102_p12 }
  0x1e   : > { %p1105_p3 = pneg %p1104_p0 }
  0x20   : > { %p1110_p7 = pnand %p1108_p5, %p1105_p3 }
  0x22   : > { %1113 = shalt.err (!%p1110_p7)
}
  0x23   : > { %s1114_s7 = scalar_lea.vmem %s166_s24, 1024  ;;  %p1122_p2 = scmp.lt.s32.totalorder %s166_s24, %s166_s24 }
  0x24   : > { %p1115_p9 = scmp.ne.s32.totalorder %s166_s24, %s1114_s7  ;;  %p1123_p6 = scmp.lt.s32.totalorder %s1114_s7, %s1114_s7 }
  0x26   : > { %p1117_p10 = pnand %p1115_p9, %p1103_p13  ;;  %p1124_p4 = por %p1123_p6, %p1122_p2 }
  0x28   : > { %p1118_p1 = pneg %p1117_p10 }
  0x2a   : > { %p1125_p8 = pnand %p1124_p4, %p1118_p1 }
  0x2c   : > { %1128 = shalt.err (!%p1125_p8)
}
  0x2d   : > { %s1622_s8 = smov 64   ;;  %s1624_s9 = smov 4  }
  0x2e   : > { %1008 = dma.hbm_to_vmem [thread:$0]  (!%p1368_p11), %s1632_s2, 1024, %s166_s24, [#allocation7], %s1622_s8, %s1622_s8, %s1624_s9  }
  0x2f   : > { %p43_p1 = scmp.ge.s32.totalorder %s41_s26, 2  ;;  %s50_s19 = sadd.s32 1, %s1267_s14 }
  0x30   : > { %p57_p2 = scmp.ne.s32.totalorder %s1267_s14, %s1263_s13  ;;  %p58_p4 = scmp.eq.s32.totalorder %s1279_s17, 0 }
  0x31   : > { %s1652_s26 = smov (%p43_p1, %s41_s26), 0  ;;  %p1634_p8 = scmp.eq.s32.totalorder %s1340_s18, 1 }
  0x32   : > { %p1398_p6 = por %p58_p4, %p57_p2  ;;  %s45_s27 = ssub.s32 %s1275_s16, %s1652_s26 }
  0x33   : > { %p1404_p10 = por %p1634_p8, %p57_p2  ;;  %p1021_p12 = scmp.lt.s32.totalorder %s1279_s17, 2 }
  0x34   : > { %p48_p11 = scmp.eq.s32.totalorder %s45_s27, 0  ;;  %s179_s24 = sand.u32 1, %s1267_s14  }
  0x35   : > { %s856_s28 = sshll.u32 %s179_s24, 6  ;;  %s896_s30 = sshll.u32 %s1275_s16, 10 }
  0x36   : > { %s1413_s29 = scalar_select %p48_p11, %s1267_s14, %s50_s19  }
  0x37   : > { %s1636_s0 = sld [smem:[#allocation14_spill]]  ;;  %s183_s7 = scalar_lea.vmem [#allocation3], %s856_s28 }
  0x38   : > { %s192_s10 = sshll.u32 %s183_s7, 4  ;;  %p1425_p13 = pnand %p1021_p12, %p1398_p6  ;;  %s1421_s10 = int_to_ptr.vmem [resolvable:$true] %s192_s10 }
  0x39   : > { %s1432_s4 = scalar_lea.hbm %s1616_s1, %s896_s30  ;;  %s206_s5 = scalar_lea.vmem [#allocation6], %s856_s28 }
  0x3a   : > { %s1434_s8 = sshll.u32 %s206_s5, 4  ;;  %s1436_s9 = scalar_lea.sflag [#allocation4], %s179_s24  ;;  %s1468_s8 = int_to_ptr.vmem [resolvable:$true] %s1434_s8 }
  0x3b   : > { %p1131_p3 = pneg %p1425_p13 }
  0x3d   : > { %s1419_s6 = scalar_lea.hbm %s1636_s0, %s896_s30  ;;  %s1134_s19 = scalar_lea.hbm %s1636_s0, 2048 }
  0x3e   : > { %s1129_s7 = scalar_lea.hbm %s1419_s6, 1024  ;;  %p1135_p9 = scmp.lt.u32.totalorder %s1419_s6, %s1636_s0 }
  0x3f   : > { %p1130_p0 = scmp.ne.s32.totalorder %s1419_s6, %s1129_s7  ;;  %p1136_p1 = scmp.lt.u32.totalorder %s1134_s19, %s1129_s7 }
  0x40   : > { %p1138_p4 = scmp.lt.u32.totalorder %s1129_s7, %s1419_s6 }
  0x41   : > { %p1132_p5 = pnand %p1131_p3, %p1130_p0  ;;  %p1137_p2 = por %p1136_p1, %p1135_p9 }
  0x43   : > { %p1133_p7 = pneg %p1132_p5  ;;  %p1139_p6 = por %p1138_p4, %p1137_p2 }
  0x45   : > { %p1140_p8 = pnand %p1139_p6, %p1133_p7 }
  0x47   : > { %1143 = shalt.err (!%p1140_p8)
}
  0x48   : > { %s1144_s24 = scalar_lea.vmem %s1421_s10, 1024  ;;  %s1284_s2 = smov [#allocation3]  }
  0x49   : > { %p1145_p12 = scmp.ne.s32.totalorder %s1421_s10, %s1144_s24  ;;  %s1149_s28 = sshll.u32 %s1284_s2, 4  ;;  %s1150_s28 = int_to_ptr.vmem [resolvable:$false] %s1149_s28 }
  0x4a   : > { %s1151_s5 = scalar_lea.vmem %s1150_s28, 2048  ;;  %p1152_p5 = scmp.lt.s32.totalorder %s1421_s10, %s1150_s28 }
  0x4b   : > { %p1147_p11 = pnand %p1145_p12, %p1131_p3  ;;  %p1153_p9 = scmp.lt.s32.totalorder %s1151_s5, %s1144_s24 }
  0x4d   : > { %p1148_p0 = pneg %p1147_p11  ;;  %p1154_p1 = por %p1153_p9, %p1152_p5 }
  0x4f   : > { %p1155_p2 = pnand %p1154_p1, %p1148_p0 }
  0x51   : > { %1158 = shalt.err (!%p1155_p2)
}
  0x52   : > { %s1638_s7 = smov 4   ;;  %s1639_s23 = smov 64  }
  0x53   : > { %1012 = dma.hbm_to_vmem [thread:$0]  (!%p1425_p13), %s1419_s6, 1024, %s1421_s10, %s1436_s9, %s1639_s23, %s1639_s23, %s1638_s7  }
  0x54   : > { %s202_s19 = sand.u32 1, %s1279_s17   ;;  %s1159_s30 = scalar_lea.hbm %s1432_s4, 1024 }
  0x55   : > { %s1471_s27 = scalar_lea.sflag [#allocation7], %s202_s19  ;;  %p1160_p7 = scmp.ne.s32.totalorder %s1432_s4, %s1159_s30 }
  0x56   : > { %s1164_s28 = scalar_lea.hbm %s1616_s1, 2048  ;;  %p1165_p8 = scmp.lt.u32.totalorder %s1432_s4, %s1616_s1 }
  0x57   : > { %p1162_p4 = pnand %p1160_p7, %p1131_p3  ;;  %p1166_p12 = scmp.lt.u32.totalorder %s1164_s28, %s1159_s30 }
  0x58   : > { %p1168_p0 = scmp.lt.u32.totalorder %s1159_s30, %s1432_s4 }
  0x59   : > { %p1163_p6 = pneg %p1162_p4  ;;  %p1167_p11 = por %p1166_p12, %p1165_p8 }
  0x5b   : > { %p1169_p5 = por %p1168_p0, %p1167_p11 }
  0x5d   : > { %p1170_p9 = pnand %p1169_p5, %p1163_p6 }
  0x5f   : > { %1173 = shalt.err (!%p1170_p9)
}
  0x60   : > { %s1174_s9 = scalar_lea.vmem %s1468_s8, 1024  ;;  %s1285_s6 = smov [#allocation6]  }
  0x61   : > { %p1175_p1 = scmp.ne.s32.totalorder %s1468_s8, %s1174_s9  ;;  %s1179_s10 = sshll.u32 %s1285_s6, 4  ;;  %s1180_s10 = int_to_ptr.vmem [resolvable:$false] %s1179_s10 }
  0x62   : > { %s1181_s0 = scalar_lea.vmem %s1180_s10, 2048  ;;  %p1182_p4 = scmp.lt.s32.totalorder %s1468_s8, %s1180_s10 }
  0x63   : > { %p1177_p2 = pnand %p1175_p1, %p1131_p3  ;;  %p1183_p8 = scmp.lt.s32.totalorder %s1181_s0, %s1174_s9 }
  0x65   : > { %p1178_p7 = pneg %p1177_p2  ;;  %p1184_p12 = por %p1183_p8, %p1182_p4 }
  0x67   : > { %p1185_p11 = pnand %p1184_p12, %p1178_p7 }
  0x69   : > { %1188 = shalt.err (!%p1185_p11)
}
  0x6a   : > { %1015 = dma.hbm_to_vmem [thread:$0]  (!%p1425_p13), %s1432_s4, 1024, %s1468_s8, %s1471_s27, %s1639_s23, %s1639_s23, %s1638_s7  }
  0x6b   : > { %p1640_p3 = scmp.ne.s32.totalorder %s1630_s22, 0 }
  0x6c   : > { %s1503_s19 = sand.u32 (!%p1640_p3), 1, %s1263_s13   ;;  %p1641_p6 = scmp.ne.s32.totalorder (!%p1640_p3), %s1628_s20, 0 }
  0x6d   : > { %227 = sbr.rel (%p1640_p3) target bundleno = 628 (0x274), region = 32  ;;  %s863_s30 = sshll.u32 (!%p1640_p3), %s1503_s19, 6 }
  0x6e   : > { %s230_s24 = scalar_lea.sflag (!%p1640_p3), [#allocation4], %s1503_s19  ;;  %s1507_s2 = scalar_lea.vmem (!%p1640_p3), [#allocation3], %s863_s30 }
  0x74   : > { %1242 = dma.done.wait (%p1641_p6), %s230_s24, 1024  }
  0x75   : > { %1244 = vsyncadd (%p1641_p6), %s230_s24, 4294966272  ;;  %s238_s8 = sand.u32 1, %s1340_s18   ;;  %s1514_s11 = scalar_lea.vmem [#allocation6], %s863_s30 }
  0x76   : > { %s239_s22 = scalar_lea.sflag [#allocation7], %s238_s8 }
  0x77   : > { %1246 = dma.done.wait (%p1641_p6), %s239_s22, 1024  }
  0x78   : > { %1248 = vsyncadd (%p1641_p6), %s239_s22, 4294966272  ;;  %p1642_p13 = scmp.eq.s32.totalorder %s1340_s18, 0 }
  0x7a   : > { %1250 = dma.done.wait (%p1642_p13), [#allocation7], 1024   ;;  %p1643_p0 = pmov %p1642_p13 }
  0x7b   : > { %v1077_v0 = vld [vmem:[#allocation8] sm:$0xff]   ;;  %v1078_v1 = vld [vmem:[#allocation8 + $0x8] sm:$0xff]   ;;  %v1079_v2 = vld [vmem:[#allocation8 + $0x10] sm:$0xff]   ;;  %s866_s18 = sshll.u32 %s1503_s19, 7  ;;  %s898_s4 = sshll.u32 %s1271_s15, 11 }
  0x7c   : > { %1252 = vsyncadd (%p1643_p0), [#allocation7], 4294966272  ;;  %931 = vmatprep.subr.bf16.mxu0 %v1077_v0  ;;  %v1080_v3 = vld [vmem:[#allocation8 + $0x18] sm:$0xff]   ;;  %v1085_v4 = vld [vmem:[%s1507_s2] sm:$0xff]   ;;  %s1541_s20 = scalar_lea.vmem [#allocation9], %s866_s18  ;;  %s1561_s28 = scalar_lea.hbm %s1618_s3, %s898_s4 }
  0x7d   : > { %932 = vmatpush3.bf16.msra.mxu0 %v1077_v0  ;;  %947 = vmatprep.mubr.bf16.mxu0 %v1085_v4  ;;  %v1081_v5 = vld [vmem:[#allocation8 + $0x20] sm:$0xff]   ;;  %v1082_v6 = vld [vmem:[#allocation8 + $0x28] sm:$0xff]   ;;  %v1083_v9 = vld [vmem:[#allocation8 + $0x30] sm:$0xff]   ;;  %s725_s7 = sshll.u32 %s1541_s20, 4  ;;  %s709_s15 = scalar_lea.sflag [#allocation5], %s1503_s19  ;;  %s1563_s7 = int_to_ptr.vmem [resolvable:$true] %s725_s7 }
  0x7e   : > { %933 = vmatprep.subr.bf16.mxu0 %v1078_v1  ;;  %v1093_v7 = vld [vmem:[%s1514_s11] sm:$0xff]   ;;  %v1094_v8 = vld [vmem:[%s1514_s11 + $0x8] sm:$0xff]   ;;  %v1084_v10 = vld [vmem:[#allocation8 + $0x38] sm:$0xff]   ;;  %s1189_s5 = scalar_lea.vmem %s1563_s7, 2048  ;;  %s1286_s9 = smov [#allocation9]  }
  0x7f   : > { %963 = vmatprep.subr.bf16.mxu1 %v1093_v7  ;;  %v1095_v11 = vld [vmem:[%s1514_s11 + $0x10] sm:$0xff]   ;;  %v1086_v12 = vld [vmem:[%s1507_s2 + $0x8] sm:$0xff]   ;;  %v1096_v14 = vld [vmem:[%s1514_s11 + $0x18] sm:$0xff]   ;;  %p1190_p5 = scmp.ne.s32.totalorder %s1563_s7, %s1189_s5  ;;  %s1193_s6 = sshll.u32 %s1286_s9, 4  ;;  %s1194_s6 = int_to_ptr.vmem [resolvable:$false] %s1193_s6 }
  0x80   : > { %964 = vmatpush3.bf16.xpose.msra.mxu1 %v1093_v7  ;;  %v1087_v13 = vld [vmem:[%s1507_s2 + $0x10] sm:$0xff]   ;;  %v1088_v15 = vld [vmem:[%s1507_s2 + $0x18] sm:$0xff]   ;;  %v1089_v16 = vld [vmem:[%s1507_s2 + $0x20] sm:$0xff]   ;;  %s1195_s10 = scalar_lea.vmem %s1194_s6, 4096  ;;  %p1196_p2 = scmp.lt.s32.totalorder %s1563_s7, %s1194_s6 }
  0x81   : > { %934 = vmatpush3.bf16.msra.mxu0 %v1078_v1  ;;  %965 = vmatprep.subr.bf16.mxu1 %v1094_v8  ;;  %v1097_v17 = vld [vmem:[%s1514_s11 + $0x20] sm:$0xff]   ;;  %v1090_v18 = vld [vmem:[%s1507_s2 + $0x28] sm:$0xff]   ;;  %v1091_v19 = vld [vmem:[%s1507_s2 + $0x30] sm:$0xff]   ;;  %p1191_p9 = pnand %p1190_p5, %p1404_p10  ;;  %p1197_p7 = scmp.lt.s32.totalorder %s1195_s10, %s1189_s5 }
  0x82   : > { %935 = vmatprep.subr.bf16.mxu0 %v1079_v2  ;;  %v1098_v20 = vld [vmem:[%s1514_s11 + $0x28] sm:$0xff]   ;;  %v1092_v21 = vld [vmem:[%s1507_s2 + $0x38] sm:$0xff]   ;;  %v1099_v22 = vld [vmem:[%s1514_s11 + $0x30] sm:$0xff]  }
  0x83   : > { %v1100_v23 = vld [vmem:[%s1514_s11 + $0x38] sm:$0xff]   ;;  %p1192_p1 = pneg %p1191_p9  ;;  %p1198_p4 = por %p1197_p7, %p1196_p2 }
  0x85   : > { %936 = vmatpush3.bf16.msra.mxu0 %v1079_v2  ;;  %p1199_p8 = pnand %p1198_p4, %p1192_p1 }
  0x86   : > { %937 = vmatprep.subr.bf16.mxu0 %v1080_v3 }
  0x88   : > { %966 = vmatpush3.bf16.xpose.msra.mxu1 %v1094_v8 }
  0x89   : > { %938 = vmatpush3.bf16.msra.mxu0 %v1080_v3  ;;  %967 = vmatprep.subr.bf16.mxu1 %v1095_v11 }
  0x8a   : > { %939 = vmatprep.subr.bf16.mxu0 %v1081_v5 }
  0x8d   : > { %940 = vmatpush3.bf16.msra.mxu0 %v1081_v5 }
  0x8e   : > { %941 = vmatprep.subr.bf16.mxu0 %v1082_v6 }
  0x90   : > { %968 = vmatpush3.bf16.xpose.msra.mxu1 %v1095_v11 }
  0x91   : > { %942 = vmatpush3.bf16.msra.mxu0 %v1082_v6  ;;  %969 = vmatprep.subr.bf16.mxu1 %v1096_v14 }
  0x92   : > { %943 = vmatprep.subr.bf16.mxu0 %v1083_v9 }
  0x95   : > { %944 = vmatpush3.bf16.msra.mxu0 %v1083_v9 }
  0x96   : > { %945 = vmatprep.subr.bf16.mxu0 %v1084_v10 }
  0x98   : > { %970 = vmatpush3.bf16.xpose.msra.mxu1 %v1096_v14 }
  0x99   : > { %946 = vmatpush3.bf16.msra.mxu0 %v1084_v10  ;;  %971 = vmatprep.subr.bf16.mxu1 %v1097_v17 }
  0x9c   : > { %948 = vmatmul.mubr.bf16.vlgmr.msra.gmra.mrb[0].mxu0 %v1086_v12 }
  0x9d   : > { %951 = vmatprep.mubr.bf16.mxu0 %v1087_v13 }
  0xa0   : > { %972 = vmatpush3.bf16.xpose.msra.mxu1 %v1097_v17 }
  0xa1   : > { %973 = vmatprep.subr.bf16.mxu1 %v1098_v20 }
  0xa4   : > { %952 = vmatmul.mubr.bf16.gmra.mrb[4].mxu0 %v1088_v15 }
  0xa5   : > { %955 = vmatprep.mubr.bf16.mxu0 %v1089_v16 }
  0xa8   : > { %974 = vmatpush3.bf16.xpose.msra.mxu1 %v1098_v20 }
  0xa9   : > { %975 = vmatprep.subr.bf16.mxu1 %v1099_v22 }
  0xac   : > { %956 = vmatmul.mubr.bf16.gmra.mrb[8].mxu0 %v1090_v18 }
  0xad   : > { %959 = vmatprep.mubr.bf16.mxu0 %v1091_v19 }
  0xb0   : > { %976 = vmatpush3.bf16.xpose.msra.mxu1 %v1099_v22 }
  0xb1   : > { %977 = vmatprep.subr.bf16.mxu1 %v1100_v23 }
  0xb4   : > { %960 = vmatmul.mubr.bf16.gmra.mrb[12].mxu0 %v1092_v21 }
  0xb8   : > { %978 = vmatpush3.bf16.xpose.msra.mxu1 %v1100_v23 }
 0x16f   : > { %v949_v24 = vpop.f32.mrb[0].mxu0 }
 0x170   : > { %v444_v25 = vpop.f32.mrb[1].mxu0 }
 0x171   : > { %v950_v26 = vpop.f32.mrb[2].mxu0 }
 0x172   : > { %v508_v27 = vpack.c.bf16 %v950_v26, %v949_v24  ;;  %v447_v28 = vpop.f32.mrb[3].mxu0 }
 0x173   : > { %v507_v29 = vpack.c.bf16 %v447_v28, %v444_v25 }
 0x175   : > { %979 = vmatprep.mubr.bf16.mxu1 %v507_v29 }
 0x176   : > { %980 = vmatmul.mubr.bf16.vlgmr.msra.gmra.mrb[0].mxu1 %v508_v27 }
 0x177   : > { %v953_v30 = vpop.f32.mrb[4].mxu0 }
 0x178   : > { %v460_v31 = vpop.f32.mrb[5].mxu0 }
 0x179   : > { %v954_v32 = vpop.f32.mrb[6].mxu0 }
 0x17a   : > { %v510_v33 = vpack.c.bf16 %v954_v32, %v953_v30  ;;  %v463_v34 = vpop.f32.mrb[7].mxu0 }
 0x17b   : > { %v509_v35 = vpack.c.bf16 %v463_v34, %v460_v31 }
 0x17d   : > { %983 = vmatprep.mubr.bf16.mxu1 %v509_v35 }
 0x17e   : > { %984 = vmatmul.mubr.bf16.gmra.mrb[4].mxu1 %v510_v33 }
 0x17f   : > { %v957_v36 = vpop.f32.mrb[8].mxu0 }
 0x180   : > { %v476_v37 = vpop.f32.mrb[9].mxu0 }
 0x181   : > { %v958_v38 = vpop.f32.mrb[10].mxu0 }
 0x182   : > { %v512_v39 = vpack.c.bf16 %v958_v38, %v957_v36  ;;  %v479_v40 = vpop.f32.mrb[11].mxu0 }
 0x183   : > { %v511_v41 = vpack.c.bf16 %v479_v40, %v476_v37 }
 0x185   : > { %987 = vmatprep.mubr.bf16.mxu1 %v511_v41 }
 0x186   : > { %988 = vmatmul.mubr.bf16.gmra.mrb[8].mxu1 %v512_v39 }
 0x187   : > { %v961_v42 = vpop.f32.mrb[12].mxu0 }
 0x188   : > { %v492_v43 = vpop.f32.mrb[13].mxu0 }
 0x189   : > { %v962_v44 = vpop.f32.mrb[14].mxu0 }
 0x18a   : > { %v514_v45 = vpack.c.bf16 %v962_v44, %v961_v42  ;;  %v495_v46 = vpop.f32.mrb[15].mxu0 }
 0x18b   : > { %v513_v47 = vpack.c.bf16 %v495_v46, %v492_v43 }
 0x18d   : > { %991 = vmatprep.mubr.bf16.mxu1 %v513_v47 }
 0x18e   : > { %992 = vmatmul.mubr.bf16.gmra.mrb[12].mxu1 %v514_v45 }
 0x249   : > { %v981_v48 = vpop.f32.mrb[0].mxu1 }
 0x24a   : > { %694 = vst [vmem:[%s1541_s20 + $0x10] sm:$0xff] %v981_v48  ;;  %v629_v49 = vpop.f32.mrb[1].mxu1 }
 0x24b   : > { %692 = vst [vmem:[%s1541_s20] sm:$0xff] %v629_v49  ;;  %v982_v50 = vpop.f32.mrb[2].mxu1 }
 0x24c   : > { %695 = vst [vmem:[%s1541_s20 + $0x18] sm:$0xff] %v982_v50  ;;  %v632_v51 = vpop.f32.mrb[3].mxu1 }
 0x24d   : > { %693 = vst [vmem:[%s1541_s20 + $0x8] sm:$0xff] %v632_v51 }
 0x251   : > { %v985_v52 = vpop.f32.mrb[4].mxu1 }
 0x252   : > { %698 = vst [vmem:[%s1541_s20 + $0x30] sm:$0xff] %v985_v52  ;;  %v645_v53 = vpop.f32.mrb[5].mxu1 }
 0x253   : > { %696 = vst [vmem:[%s1541_s20 + $0x20] sm:$0xff] %v645_v53  ;;  %v986_v54 = vpop.f32.mrb[6].mxu1 }
 0x254   : > { %699 = vst [vmem:[%s1541_s20 + $0x38] sm:$0xff] %v986_v54  ;;  %v648_v55 = vpop.f32.mrb[7].mxu1 }
 0x255   : > { %697 = vst [vmem:[%s1541_s20 + $0x28] sm:$0xff] %v648_v55 }
 0x259   : > { %v989_v56 = vpop.f32.mrb[8].mxu1 }
 0x25a   : > { %702 = vst [vmem:[%s1541_s20 + $0x50] sm:$0xff] %v989_v56  ;;  %v661_v57 = vpop.f32.mrb[9].mxu1 }
 0x25b   : > { %700 = vst [vmem:[%s1541_s20 + $0x40] sm:$0xff] %v661_v57  ;;  %v990_v58 = vpop.f32.mrb[10].mxu1 }
 0x25c   : > { %703 = vst [vmem:[%s1541_s20 + $0x58] sm:$0xff] %v990_v58  ;;  %v664_v59 = vpop.f32.mrb[11].mxu1 }
 0x25d   : > { %701 = vst [vmem:[%s1541_s20 + $0x48] sm:$0xff] %v664_v59 }
 0x261   : > { %v993_v60 = vpop.f32.mrb[12].mxu1 }
 0x262   : > { %706 = vst [vmem:[%s1541_s20 + $0x70] sm:$0xff] %v993_v60  ;;  %v677_v61 = vpop.f32.mrb[13].mxu1 }
 0x263   : > { %704 = vst [vmem:[%s1541_s20 + $0x60] sm:$0xff] %v677_v61  ;;  %v994_v62 = vpop.f32.mrb[14].mxu1 }
 0x264   : > { %707 = vst [vmem:[%s1541_s20 + $0x78] sm:$0xff] %v994_v62  ;;  %v680_v63 = vpop.f32.mrb[15].mxu1 }
 0x265   : > { %705 = vst [vmem:[%s1541_s20 + $0x68] sm:$0xff] %v680_v63 }
 0x266   : > { %1202 = shalt.err (!%p1199_p8)
}
 0x267   : > { %s1203_s0 = scalar_lea.hbm %s1561_s28, 2048  ;;  %s1207_s2 = scalar_lea.hbm %s1618_s3, 4096 }
 0x268   : > { %p1204_p12 = scmp.ne.s32.totalorder %s1561_s28, %s1203_s0  ;;  %p1208_p6 = scmp.lt.u32.totalorder %s1561_s28, %s1618_s3 }
 0x269   : > { %p1209_p13 = scmp.lt.u32.totalorder %s1207_s2, %s1203_s0  ;;  %p1211_p5 = scmp.lt.u32.totalorder %s1203_s0, %s1561_s28 }
 0x26a   : > { %p1205_p11 = pnand %p1204_p12, %p1404_p10 }
 0x26b   : > { %p1210_p0 = por %p1209_p13, %p1208_p6 }
 0x26c   : > { %p1206_p3 = pneg %p1205_p11 }
 0x26d   : > { %p1212_p9 = por %p1211_p5, %p1210_p0 }
 0x26f   : > { %p1213_p1 = pnand %p1212_p9, %p1206_p3 }
 0x271   : > { %1216 = shalt.err (!%p1213_p1)
}
 0x272   : > { %s1287_s11 = smov 128   ;;  %s1288_s18 = smov 8  }
 0x273   : > { %1003 = dma.vmem_to_hbm [thread:$0]  (%p1404_p10), %s1563_s7, 2048, %s1561_s28, %s709_s15, %s1287_s11, %s1287_s11, %s1288_s18  }
 0x274 PF: > { %s740_s20 = sand.u32 1, %s1259_s12   ;;  %p1644_p2 = scmp.ne.s32.totalorder %s1629_s21, 0 }
 0x275   : > { %p1645_p7 = scmp.ge.s32.totalorder %s1279_s17, 2  ;;  %s741_s4 = scalar_lea.sflag [#allocation5], %s740_s20 }
 0x277   : > { %p1017_p4 = pnand %p1645_p7, %p1644_p2 }
 0x279   : > { %1254 = dma.done.wait (!%p1017_p4), %s741_s4, 2048  }
 0x27a   : > { %1256 = vsyncadd (!%p1017_p4), %s741_s4, 4294965248  ;;  %s22_s17 = sadd.s32 1, %s1279_s17   ;;  %s1646_s12 = smov %s1263_s13 }
 0x27b   : > { %p19_p8 = scmp.ge.s32.totalorder %s22_s17, 4   ;;  %s1647_s13 = smov %s1267_s14 }
 0x27c   : > { %s1648_s14 = smov %s1413_s29  ;;  %s1649_s15 = smov %s1275_s16 }
 0x27d   : > { %s1650_s16 = smov %s1652_s26  ;;  %21 = sbr.rel (!%p19_p8) target bundleno = 11 (0xb), region = 98 }
 0x284   :  { %746 = vsyncpa [#allocation4], 1 }
 0x285   :  { %748 = vsyncpa [#allocation4 + $0x1], 1 }
 0x286   :  { %749 = vsyncpa [#allocation7], 1 }
 0x287   :  { %751 = vsyncpa [#allocation7 + $0x1], 1 }
 0x288   :  { %752 = vsyncpa [#allocation5], 1 }
 0x289   :  { %754 = vsyncpa [#allocation5 + $0x1], 1 }

// kernel: tpu_custom_call.1
= control target key start
LH: loop header
LB: loop body
LE: loop exit
PB: predicated region body
PF: predicated region fallthrough
CT: control target
= control target key end

     0   :  { %s1615_s0 = inlined_call_operand.hbm [shape: bf16[2,128,128], index: 0, kind: input, shape index: {}]   ;;  %s1616_s1 = inlined_call_operand.hbm [shape: bf16[2,128,128], index: 1, kind: input, shape index: {}]   ;;  %s1617_s2 = inlined_call_operand.hbm [shape: bf16[128,128], index: 2, kind: input, shape index: {}]   ;;  %s1618_s3 = inlined_call_operand.hbm [shape: f32[2,128,128], index: 3, kind: output, shape index: {}]  }
   0x1   :  { %1626 = sst [smem:[#allocation14_spill]] %s1615_s0 }
   0x2   :  { %1627 = sst [smem:[#allocation15_spill]] %s1617_s2 }
   0x3   :  { %8 = vsyncpa [#allocation4], 0 }
   0x4   :  { %10 = vsyncpa [#allocation4 + $0x1], 0 }
   0x5   :  { %11 = vsyncpa [#allocation7], 0 }
   0x6   :  { %13 = vsyncpa [#allocation7 + $0x1], 0 }
   0x7   :  { %14 = vsyncpa [#allocation5], 0 }
   0x8   :  { %16 = vsyncpa [#allocation5 + $0x1], 0  ;;  %s1309_s12 = smov 0   ;;  %s1311_s13 = smov 0  }
   0x9   :  { %s1313_s14 = smov 0   ;;  %s1315_s15 = smov 0  }
   0xa   :  { %s1317_s16 = smov 0   ;;  %s1319_s17 = smov 0  }
   0xb LB: > { %s1340_s18 = sadd.s32 4294967295, %s1279_s17   ;;  %s852_s19 = sadd.s32 4294967294, %s1279_s17   ;;  %s1279_s17 = sphi %s1319_s17, %s22_s17   ;;  %s1275_s16 = sphi %s1317_s16, %s1650_s16   ;;  %s1271_s15 = sphi %s1315_s15, %s1649_s15   ;;  %s1267_s14 = sphi %s1313_s14, %s1648_s14   ;;  %s1263_s13 = sphi %s1311_s13, %s1647_s13   ;;  %s1259_s12 = sphi %s1309_s12, %s1646_s12  }
   0xc   : > { %p63_p0 = scmp.ne.s32.totalorder %s1263_s13, %s1259_s12  ;;  %p1619_p1 = scmp.eq.s32.totalorder %s1340_s18, 0 }
   0xd   : > { %p146_p3 = scmp.eq.s32.totalorder %s852_s19, 1  ;;  %p853_p5 = scmp.ge.s32.totalorder %s1279_s17, 1 }
   0xe   : > { %p1349_p4 = por %p1619_p1, %p63_p0  ;;  %p153_p7 = scmp.lt.s32.totalorder %s1279_s17, 3 }
   0xf   : > { %p1354_p6 = por %p146_p3, %p63_p0  ;;  %s1281_s23 = smov [#allocation8]  }
  0x10   : > { %s1628_s20 = scalar_select %p1349_p4, 1, 0 }
  0x11   : > { %s1629_s21 = scalar_select %p1354_p6, 1, 0 }
  0x12   : > { %p1359_p8 = pnand %p853_p5, %p153_p7  ;;  %s165_s24 = sshll.u32 %s1281_s23, 4  ;;  %s166_s24 = int_to_ptr.vmem [resolvable:$true] %s165_s24 }
  0x13   : > { %s41_s26 = sadd.s32 1, %s1275_s16  ;;  %s1632_s2 = sld [smem:[#allocation15_spill]] }
  0x14   : > { %s1630_s22 = scalar_select %p1359_p8, 1, 0 }
  0x15   : > { %p1005_p9 = pneg %p1359_p8 }
  0x17   : > { %p1368_p11 = pnand %p1005_p9, %p1619_p1 }
  0x19   : > { %s1101_s29 = scalar_lea.hbm %s1632_s2, 1024  ;;  %p1103_p13 = pneg %p1368_p11 }
  0x1a   : > { %p1102_p12 = scmp.ne.s32.totalorder %s1632_s2, %s1101_s29  ;;  %p1108_p5 = scmp.lt.u32.totalorder %s1101_s29, %s1632_s2 }
  0x1c   : > { %p1104_p0 = pnand %p1103_p13, %p1102_p12 }
  0x1e   : > { %p1105_p3 = pneg %p1104_p0 }
  0x20   : > { %p1110_p7 = pnand %p1108_p5, %p1105_p3 }
  0x22   : > { %1113 = shalt.err (!%p1110_p7)
}
  0x23   : > { %s1114_s7 = scalar_lea.vmem %s166_s24, 1024  ;;  %p1122_p2 = scmp.lt.s32.totalorder %s166_s24, %s166_s24 }
  0x24   : > { %p1115_p9 = scmp.ne.s32.totalorder %s166_s24, %s1114_s7  ;;  %p1123_p6 = scmp.lt.s32.totalorder %s1114_s7, %s1114_s7 }
  0x26   : > { %p1117_p10 = pnand %p1115_p9, %p1103_p13  ;;  %p1124_p4 = por %p1123_p6, %p1122_p2 }
  0x28   : > { %p1118_p1 = pneg %p1117_p10 }
  0x2a   : > { %p1125_p8 = pnand %p1124_p4, %p1118_p1 }
  0x2c   : > { %1128 = shalt.err (!%p1125_p8)
}
  0x2d   : > { %s1622_s8 = smov 64   ;;  %s1624_s9 = smov 4  }
  0x2e   : > { %1008 = dma.hbm_to_vmem [thread:$0]  (!%p1368_p11), %s1632_s2, 1024, %s166_s24, [#allocation7], %s1622_s8, %s1622_s8, %s1624_s9  }
  0x2f   : > { %p43_p1 = scmp.ge.s32.totalorder %s41_s26, 2  ;;  %s50_s19 = sadd.s32 1, %s1267_s14 }
  0x30   : > { %p57_p2 = scmp.ne.s32.totalorder %s1267_s14, %s1263_s13  ;;  %p58_p4 = scmp.eq.s32.totalorder %s1279_s17, 0 }
  0x31   : > { %s1652_s26 = smov (%p43_p1, %s41_s26), 0  ;;  %p1634_p8 = scmp.eq.s32.totalorder %s1340_s18, 1 }
  0x32   : > { %p1398_p6 = por %p58_p4, %p57_p2  ;;  %s45_s27 = ssub.s32 %s1275_s16, %s1652_s26 }
  0x33   : > { %p1404_p10 = por %p1634_p8, %p57_p2  ;;  %p1021_p12 = scmp.lt.s32.totalorder %s1279_s17, 2 }
  0x34   : > { %p48_p11 = scmp.eq.s32.totalorder %s45_s27, 0  ;;  %s179_s24 = sand.u32 1, %s1267_s14  }
  0x35   : > { %s856_s28 = sshll.u32 %s179_s24, 6  ;;  %s896_s30 = sshll.u32 %s1275_s16, 10 }
  0x36   : > { %s1413_s29 = scalar_select %p48_p11, %s1267_s14, %s50_s19  }
  0x37   : > { %s1636_s0 = sld [smem:[#allocation14_spill]]  ;;  %s183_s7 = scalar_lea.vmem [#allocation3], %s856_s28 }
  0x38   : > { %s192_s10 = sshll.u32 %s183_s7, 4  ;;  %p1425_p13 = pnand %p1021_p12, %p1398_p6  ;;  %s1421_s10 = int_to_ptr.vmem [resolvable:$true] %s192_s10 }
  0x39   : > { %s1432_s4 = scalar_lea.hbm %s1616_s1, %s896_s30  ;;  %s206_s5 = scalar_lea.vmem [#allocation6], %s856_s28 }
  0x3a   : > { %s1434_s8 = sshll.u32 %s206_s5, 4  ;;  %s1436_s9 = scalar_lea.sflag [#allocation4], %s179_s24  ;;  %s1468_s8 = int_to_ptr.vmem [resolvable:$true] %s1434_s8 }
  0x3b   : > { %p1131_p3 = pneg %p1425_p13 }
  0x3d   : > { %s1419_s6 = scalar_lea.hbm %s1636_s0, %s896_s30  ;;  %s1134_s19 = scalar_lea.hbm %s1636_s0, 2048 }
  0x3e   : > { %s1129_s7 = scalar_lea.hbm %s1419_s6, 1024  ;;  %p1135_p9 = scmp.lt.u32.totalorder %s1419_s6, %s1636_s0 }
  0x3f   : > { %p1130_p0 = scmp.ne.s32.totalorder %s1419_s6, %s1129_s7  ;;  %p1136_p1 = scmp.lt.u32.totalorder %s1134_s19, %s1129_s7 }
  0x40   : > { %p1138_p4 = scmp.lt.u32.totalorder %s1129_s7, %s1419_s6 }
  0x41   : > { %p1132_p5 = pnand %p1131_p3, %p1130_p0  ;;  %p1137_p2 = por %p1136_p1, %p1135_p9 }
  0x43   : > { %p1133_p7 = pneg %p1132_p5  ;;  %p1139_p6 = por %p1138_p4, %p1137_p2 }
  0x45   : > { %p1140_p8 = pnand %p1139_p6, %p1133_p7 }
  0x47   : > { %1143 = shalt.err (!%p1140_p8)
}
  0x48   : > { %s1144_s24 = scalar_lea.vmem %s1421_s10, 1024  ;;  %s1284_s2 = smov [#allocation3]  }
  0x49   : > { %p1145_p12 = scmp.ne.s32.totalorder %s1421_s10, %s1144_s24  ;;  %s1149_s28 = sshll.u32 %s1284_s2, 4  ;;  %s1150_s28 = int_to_ptr.vmem [resolvable:$false] %s1149_s28 }
  0x4a   : > { %s1151_s5 = scalar_lea.vmem %s1150_s28, 2048  ;;  %p1152_p5 = scmp.lt.s32.totalorder %s1421_s10, %s1150_s28 }
  0x4b   : > { %p1147_p11 = pnand %p1145_p12, %p1131_p3  ;;  %p1153_p9 = scmp.lt.s32.totalorder %s1151_s5, %s1144_s24 }
  0x4d   : > { %p1148_p0 = pneg %p1147_p11  ;;  %p1154_p1 = por %p1153_p9, %p1152_p5 }
  0x4f   : > { %p1155_p2 = pnand %p1154_p1, %p1148_p0 }
  0x51   : > { %1158 = shalt.err (!%p1155_p2)
}
  0x52   : > { %s1638_s7 = smov 4   ;;  %s1639_s23 = smov 64  }
  0x53   : > { %1012 = dma.hbm_to_vmem [thread:$0]  (!%p1425_p13), %s1419_s6, 1024, %s1421_s10, %s1436_s9, %s1639_s23, %s1639_s23, %s1638_s7  }
  0x54   : > { %s202_s19 = sand.u32 1, %s1279_s17   ;;  %s1159_s30 = scalar_lea.hbm %s1432_s4, 1024 }
  0x55   : > { %s1471_s27 = scalar_lea.sflag [#allocation7], %s202_s19  ;;  %p1160_p7 = scmp.ne.s32.totalorder %s1432_s4, %s1159_s30 }
  0x56   : > { %s1164_s28 = scalar_lea.hbm %s1616_s1, 2048  ;;  %p1165_p8 = scmp.lt.u32.totalorder %s1432_s4, %s1616_s1 }
  0x57   : > { %p1162_p4 = pnand %p1160_p7, %p1131_p3  ;;  %p1166_p12 = scmp.lt.u32.totalorder %s1164_s28, %s1159_s30 }
  0x58   : > { %p1168_p0 = scmp.lt.u32.totalorder %s1159_s30, %s1432_s4 }
  0x59   : > { %p1163_p6 = pneg %p1162_p4  ;;  %p1167_p11 = por %p1166_p12, %p1165_p8 }
  0x5b   : > { %p1169_p5 = por %p1168_p0, %p1167_p11 }
  0x5d   : > { %p1170_p9 = pnand %p1169_p5, %p1163_p6 }
  0x5f   : > { %1173 = shalt.err (!%p1170_p9)
}
  0x60   : > { %s1174_s9 = scalar_lea.vmem %s1468_s8, 1024  ;;  %s1285_s6 = smov [#allocation6]  }
  0x61   : > { %p1175_p1 = scmp.ne.s32.totalorder %s1468_s8, %s1174_s9  ;;  %s1179_s10 = sshll.u32 %s1285_s6, 4  ;;  %s1180_s10 = int_to_ptr.vmem [resolvable:$false] %s1179_s10 }
  0x62   : > { %s1181_s0 = scalar_lea.vmem %s1180_s10, 2048  ;;  %p1182_p4 = scmp.lt.s32.totalorder %s1468_s8, %s1180_s10 }
  0x63   : > { %p1177_p2 = pnand %p1175_p1, %p1131_p3  ;;  %p1183_p8 = scmp.lt.s32.totalorder %s1181_s0, %s1174_s9 }
  0x65   : > { %p1178_p7 = pneg %p1177_p2  ;;  %p1184_p12 = por %p1183_p8, %p1182_p4 }
  0x67   : > { %p1185_p11 = pnand %p1184_p12, %p1178_p7 }
  0x69   : > { %1188 = shalt.err (!%p1185_p11)
}
  0x6a   : > { %1015 = dma.hbm_to_vmem [thread:$0]  (!%p1425_p13), %s1432_s4, 1024, %s1468_s8, %s1471_s27, %s1639_s23, %s1639_s23, %s1638_s7  }
  0x6b   : > { %p1640_p3 = scmp.ne.s32.totalorder %s1630_s22, 0 }
  0x6c   : > { %s1503_s19 = sand.u32 (!%p1640_p3), 1, %s1263_s13   ;;  %p1641_p6 = scmp.ne.s32.totalorder (!%p1640_p3), %s1628_s20, 0 }
  0x6d   : > { %227 = sbr.rel (%p1640_p3) target bundleno = 628 (0x274), region = 32  ;;  %s863_s30 = sshll.u32 (!%p1640_p3), %s1503_s19, 6 }
  0x6e   : > { %s230_s24 = scalar_lea.sflag (!%p1640_p3), [#allocation4], %s1503_s19  ;;  %s1507_s2 = scalar_lea.vmem (!%p1640_p3), [#allocation3], %s863_s30 }
  0x74   : > { %1242 = dma.done.wait (%p1641_p6), %s230_s24, 1024  }
  0x75   : > { %1244 = vsyncadd (%p1641_p6), %s230_s24, 4294966272  ;;  %s238_s8 = sand.u32 1, %s1340_s18   ;;  %s1514_s11 = scalar_lea.vmem [#allocation6], %s863_s30 }
  0x76   : > { %s239_s22 = scalar_lea.sflag [#allocation7], %s238_s8 }
  0x77   : > { %1246 = dma.done.wait (%p1641_p6), %s239_s22, 1024  }
  0x78   : > { %1248 = vsyncadd (%p1641_p6), %s239_s22, 4294966272  ;;  %p1642_p13 = scmp.eq.s32.totalorder %s1340_s18, 0 }
  0x7a   : > { %1250 = dma.done.wait (%p1642_p13), [#allocation7], 1024   ;;  %p1643_p0 = pmov %p1642_p13 }
  0x7b   : > { %v1077_v0 = vld [vmem:[#allocation8] sm:$0xff]   ;;  %v1078_v1 = vld [vmem:[#allocation8 + $0x8] sm:$0xff]   ;;  %v1079_v2 = vld [vmem:[#allocation8 + $0x10] sm:$0xff]   ;;  %s866_s18 = sshll.u32 %s1503_s19, 7  ;;  %s898_s4 = sshll.u32 %s1271_s15, 11 }
  0x7c   : > { %1252 = vsyncadd (%p1643_p0), [#allocation7], 4294966272  ;;  %931 = vmatprep.subr.bf16.mxu0 %v1077_v0  ;;  %v1080_v3 = vld [vmem:[#allocation8 + $0x18] sm:$0xff]   ;;  %v1085_v4 = vld [vmem:[%s1507_s2] sm:$0xff]   ;;  %s1541_s20 = scalar_lea.vmem [#allocation9], %s866_s18  ;;  %s1561_s28 = scalar_lea.hbm %s1618_s3, %s898_s4 }
  0x7d   : > { %932 = vmatpush3.bf16.msra.mxu0 %v1077_v0  ;;  %947 = vmatprep.mubr.bf16.mxu0 %v1085_v4  ;;  %v1081_v5 = vld [vmem:[#allocation8 + $0x20] sm:$0xff]   ;;  %v1082_v6 = vld [vmem:[#allocation8 + $0x28] sm:$0xff]   ;;  %v1083_v9 = vld [vmem:[#allocation8 + $0x30] sm:$0xff]   ;;  %s725_s7 = sshll.u32 %s1541_s20, 4  ;;  %s709_s15 = scalar_lea.sflag [#allocation5], %s1503_s19  ;;  %s1563_s7 = int_to_ptr.vmem [resolvable:$true] %s725_s7 }
  0x7e   : > { %933 = vmatprep.subr.bf16.mxu0 %v1078_v1  ;;  %v1093_v7 = vld [vmem:[%s1514_s11] sm:$0xff]   ;;  %v1094_v8 = vld [vmem:[%s1514_s11 + $0x8] sm:$0xff]   ;;  %v1084_v10 = vld [vmem:[#allocation8 + $0x38] sm:$0xff]   ;;  %s1189_s5 = scalar_lea.vmem %s1563_s7, 2048  ;;  %s1286_s9 = smov [#allocation9]  }
  0x7f   : > { %963 = vmatprep.subr.bf16.mxu1 %v1093_v7  ;;  %v1095_v11 = vld [vmem:[%s1514_s11 + $0x10] sm:$0xff]   ;;  %v1086_v12 = vld [vmem:[%s1507_s2 + $0x8] sm:$0xff]   ;;  %v1096_v14 = vld [vmem:[%s1514_s11 + $0x18] sm:$0xff]   ;;  %p1190_p5 = scmp.ne.s32.totalorder %s1563_s7, %s1189_s5  ;;  %s1193_s6 = sshll.u32 %s1286_s9, 4  ;;  %s1194_s6 = int_to_ptr.vmem [resolvable:$false] %s1193_s6 }
  0x80   : > { %964 = vmatpush3.bf16.xpose.msra.mxu1 %v1093_v7  ;;  %v1087_v13 = vld [vmem:[%s1507_s2 + $0x10] sm:$0xff]   ;;  %v1088_v15 = vld [vmem:[%s1507_s2 + $0x18] sm:$0xff]   ;;  %v1089_v16 = vld [vmem:[%s1507_s2 + $0x20] sm:$0xff]   ;;  %s1195_s10 = scalar_lea.vmem %s1194_s6, 4096  ;;  %p1196_p2 = scmp.lt.s32.totalorder %s1563_s7, %s1194_s6 }
  0x81   : > { %934 = vmatpush3.bf16.msra.mxu0 %v1078_v1  ;;  %965 = vmatprep.subr.bf16.mxu1 %v1094_v8  ;;  %v1097_v17 = vld [vmem:[%s1514_s11 + $0x20] sm:$0xff]   ;;  %v1090_v18 = vld [vmem:[%s1507_s2 + $0x28] sm:$0xff]   ;;  %v1091_v19 = vld [vmem:[%s1507_s2 + $0x30] sm:$0xff]   ;;  %p1191_p9 = pnand %p1190_p5, %p1404_p10  ;;  %p1197_p7 = scmp.lt.s32.totalorder %s1195_s10, %s1189_s5 }
  0x82   : > { %935 = vmatprep.subr.bf16.mxu0 %v1079_v2  ;;  %v1098_v20 = vld [vmem:[%s1514_s11 + $0x28] sm:$0xff]   ;;  %v1092_v21 = vld [vmem:[%s1507_s2 + $0x38] sm:$0xff]   ;;  %v1099_v22 = vld [vmem:[%s1514_s11 + $0x30] sm:$0xff]  }
  0x83   : > { %v1100_v23 = vld [vmem:[%s1514_s11 + $0x38] sm:$0xff]   ;;  %p1192_p1 = pneg %p1191_p9  ;;  %p1198_p4 = por %p1197_p7, %p1196_p2 }
  0x85   : > { %936 = vmatpush3.bf16.msra.mxu0 %v1079_v2  ;;  %p1199_p8 = pnand %p1198_p4, %p1192_p1 }
  0x86   : > { %937 = vmatprep.subr.bf16.mxu0 %v1080_v3 }
  0x88   : > { %966 = vmatpush3.bf16.xpose.msra.mxu1 %v1094_v8 }
  0x89   : > { %938 = vmatpush3.bf16.msra.mxu0 %v1080_v3  ;;  %967 = vmatprep.subr.bf16.mxu1 %v1095_v11 }
  0x8a   : > { %939 = vmatprep.subr.bf16.mxu0 %v1081_v5 }
  0x8d   : > { %940 = vmatpush3.bf16.msra.mxu0 %v1081_v5 }
  0x8e   : > { %941 = vmatprep.subr.bf16.mxu0 %v1082_v6 }
  0x90   : > { %968 = vmatpush3.bf16.xpose.msra.mxu1 %v1095_v11 }
  0x91   : > { %942 = vmatpush3.bf16.msra.mxu0 %v1082_v6  ;;  %969 = vmatprep.subr.bf16.mxu1 %v1096_v14 }
  0x92   : > { %943 = vmatprep.subr.bf16.mxu0 %v1083_v9 }
  0x95   : > { %944 = vmatpush3.bf16.msra.mxu0 %v1083_v9 }
  0x96   : > { %945 = vmatprep.subr.bf16.mxu0 %v1084_v10 }
  0x98   : > { %970 = vmatpush3.bf16.xpose.msra.mxu1 %v1096_v14 }
  0x99   : > { %946 = vmatpush3.bf16.msra.mxu0 %v1084_v10  ;;  %971 = vmatprep.subr.bf16.mxu1 %v1097_v17 }
  0x9c   : > { %948 = vmatmul.mubr.bf16.vlgmr.msra.gmra.mrb[0].mxu0 %v1086_v12 }
  0x9d   : > { %951 = vmatprep.mubr.bf16.mxu0 %v1087_v13 }
  0xa0   : > { %972 = vmatpush3.bf16.xpose.msra.mxu1 %v1097_v17 }
  0xa1   : > { %973 = vmatprep.subr.bf16.mxu1 %v1098_v20 }
  0xa4   : > { %952 = vmatmul.mubr.bf16.gmra.mrb[4].mxu0 %v1088_v15 }
  0xa5   : > { %955 = vmatprep.mubr.bf16.mxu0 %v1089_v16 }
  0xa8   : > { %974 = vmatpush3.bf16.xpose.msra.mxu1 %v1098_v20 }
  0xa9   : > { %975 = vmatprep.subr.bf16.mxu1 %v1099_v22 }
  0xac   : > { %956 = vmatmul.mubr.bf16.gmra.mrb[8].mxu0 %v1090_v18 }
  0xad   : > { %959 = vmatprep.mubr.bf16.mxu0 %v1091_v19 }
  0xb0   : > { %976 = vmatpush3.bf16.xpose.msra.mxu1 %v1099_v22 }
  0xb1   : > { %977 = vmatprep.subr.bf16.mxu1 %v1100_v23 }
  0xb4   : > { %960 = vmatmul.mubr.bf16.gmra.mrb[12].mxu0 %v1092_v21 }
  0xb8   : > { %978 = vmatpush3.bf16.xpose.msra.mxu1 %v1100_v23 }
 0x16f   : > { %v949_v24 = vpop.f32.mrb[0].mxu0 }
 0x170   : > { %v444_v25 = vpop.f32.mrb[1].mxu0 }
 0x171   : > { %v950_v26 = vpop.f32.mrb[2].mxu0 }
 0x172   : > { %v508_v27 = vpack.c.bf16 %v950_v26, %v949_v24  ;;  %v447_v28 = vpop.f32.mrb[3].mxu0 }
 0x173   : > { %v507_v29 = vpack.c.bf16 %v447_v28, %v444_v25 }
 0x175   : > { %979 = vmatprep.mubr.bf16.mxu1 %v507_v29 }
 0x176   : > { %980 = vmatmul.mubr.bf16.vlgmr.msra.gmra.mrb[0].mxu1 %v508_v27 }
 0x177   : > { %v953_v30 = vpop.f32.mrb[4].mxu0 }
 0x178   : > { %v460_v31 = vpop.f32.mrb[5].mxu0 }
 0x179   : > { %v954_v32 = vpop.f32.mrb[6].mxu0 }
 0x17a   : > { %v510_v33 = vpack.c.bf16 %v954_v32, %v953_v30  ;;  %v463_v34 = vpop.f32.mrb[7].mxu0 }
 0x17b   : > { %v509_v35 = vpack.c.bf16 %v463_v34, %v460_v31 }
 0x17d   : > { %983 = vmatprep.mubr.bf16.mxu1 %v509_v35 }
 0x17e   : > { %984 = vmatmul.mubr.bf16.gmra.mrb[4].mxu1 %v510_v33 }
 0x17f   : > { %v957_v36 = vpop.f32.mrb[8].mxu0 }
 0x180   : > { %v476_v37 = vpop.f32.mrb[9].mxu0 }
 0x181   : > { %v958_v38 = vpop.f32.mrb[10].mxu0 }
 0x182   : > { %v512_v39 = vpack.c.bf16 %v958_v38, %v957_v36  ;;  %v479_v40 = vpop.f32.mrb[11].mxu0 }
 0x183   : > { %v511_v41 = vpack.c.bf16 %v479_v40, %v476_v37 }
 0x185   : > { %987 = vmatprep.mubr.bf16.mxu1 %v511_v41 }
 0x186   : > { %988 = vmatmul.mubr.bf16.gmra.mrb[8].mxu1 %v512_v39 }
 0x187   : > { %v961_v42 = vpop.f32.mrb[12].mxu0 }
 0x188   : > { %v492_v43 = vpop.f32.mrb[13].mxu0 }
 0x189   : > { %v962_v44 = vpop.f32.mrb[14].mxu0 }
 0x18a   : > { %v514_v45 = vpack.c.bf16 %v962_v44, %v961_v42  ;;  %v495_v46 = vpop.f32.mrb[15].mxu0 }
 0x18b   : > { %v513_v47 = vpack.c.bf16 %v495_v46, %v492_v43 }
 0x18d   : > { %991 = vmatprep.mubr.bf16.mxu1 %v513_v47 }
 0x18e   : > { %992 = vmatmul.mubr.bf16.gmra.mrb[12].mxu1 %v514_v45 }
 0x249   : > { %v981_v48 = vpop.f32.mrb[0].mxu1 }
 0x24a   : > { %694 = vst [vmem:[%s1541_s20 + $0x10] sm:$0xff] %v981_v48  ;;  %v629_v49 = vpop.f32.mrb[1].mxu1 }
 0x24b   : > { %692 = vst [vmem:[%s1541_s20] sm:$0xff] %v629_v49  ;;  %v982_v50 = vpop.f32.mrb[2].mxu1 }
 0x24c   : > { %695 = vst [vmem:[%s1541_s20 + $0x18] sm:$0xff] %v982_v50  ;;  %v632_v51 = vpop.f32.mrb[3].mxu1 }
 0x24d   : > { %693 = vst [vmem:[%s1541_s20 + $0x8] sm:$0xff] %v632_v51 }
 0x251   : > { %v985_v52 = vpop.f32.mrb[4].mxu1 }
 0x252   : > { %698 = vst [vmem:[%s1541_s20 + $0x30] sm:$0xff] %v985_v52  ;;  %v645_v53 = vpop.f32.mrb[5].mxu1 }
 0x253   : > { %696 = vst [vmem:[%s1541_s20 + $0x20] sm:$0xff] %v645_v53  ;;  %v986_v54 = vpop.f32.mrb[6].mxu1 }
 0x254   : > { %699 = vst [vmem:[%s1541_s20 + $0x38] sm:$0xff] %v986_v54  ;;  %v648_v55 = vpop.f32.mrb[7].mxu1 }
 0x255   : > { %697 = vst [vmem:[%s1541_s20 + $0x28] sm:$0xff] %v648_v55 }
 0x259   : > { %v989_v56 = vpop.f32.mrb[8].mxu1 }
 0x25a   : > { %702 = vst [vmem:[%s1541_s20 + $0x50] sm:$0xff] %v989_v56  ;;  %v661_v57 = vpop.f32.mrb[9].mxu1 }
 0x25b   : > { %700 = vst [vmem:[%s1541_s20 + $0x40] sm:$0xff] %v661_v57  ;;  %v990_v58 = vpop.f32.mrb[10].mxu1 }
 0x25c   : > { %703 = vst [vmem:[%s1541_s20 + $0x58] sm:$0xff] %v990_v58  ;;  %v664_v59 = vpop.f32.mrb[11].mxu1 }
 0x25d   : > { %701 = vst [vmem:[%s1541_s20 + $0x48] sm:$0xff] %v664_v59 }
 0x261   : > { %v993_v60 = vpop.f32.mrb[12].mxu1 }
 0x262   : > { %706 = vst [vmem:[%s1541_s20 + $0x70] sm:$0xff] %v993_v60  ;;  %v677_v61 = vpop.f32.mrb[13].mxu1 }
 0x263   : > { %704 = vst [vmem:[%s1541_s20 + $0x60] sm:$0xff] %v677_v61  ;;  %v994_v62 = vpop.f32.mrb[14].mxu1 }
 0x264   : > { %707 = vst [vmem:[%s1541_s20 + $0x78] sm:$0xff] %v994_v62  ;;  %v680_v63 = vpop.f32.mrb[15].mxu1 }
 0x265   : > { %705 = vst [vmem:[%s1541_s20 + $0x68] sm:$0xff] %v680_v63 }
 0x266   : > { %1202 = shalt.err (!%p1199_p8)
}
 0x267   : > { %s1203_s0 = scalar_lea.hbm %s1561_s28, 2048  ;;  %s1207_s2 = scalar_lea.hbm %s1618_s3, 4096 }
 0x268   : > { %p1204_p12 = scmp.ne.s32.totalorder %s1561_s28, %s1203_s0  ;;  %p1208_p6 = scmp.lt.u32.totalorder %s1561_s28, %s1618_s3 }
 0x269   : > { %p1209_p13 = scmp.lt.u32.totalorder %s1207_s2, %s1203_s0  ;;  %p1211_p5 = scmp.lt.u32.totalorder %s1203_s0, %s1561_s28 }
 0x26a   : > { %p1205_p11 = pnand %p1204_p12, %p1404_p10 }
 0x26b   : > { %p1210_p0 = por %p1209_p13, %p1208_p6 }
 0x26c   : > { %p1206_p3 = pneg %p1205_p11 }
 0x26d   : > { %p1212_p9 = por %p1211_p5, %p1210_p0 }
 0x26f   : > { %p1213_p1 = pnand %p1212_p9, %p1206_p3 }
 0x271   : > { %1216 = shalt.err (!%p1213_p1)
}
 0x272   : > { %s1287_s11 = smov 128   ;;  %s1288_s18 = smov 8  }
 0x273   : > { %1003 = dma.vmem_to_hbm [thread:$0]  (%p1404_p10), %s1563_s7, 2048, %s1561_s28, %s709_s15, %s1287_s11, %s1287_s11, %s1288_s18  }
 0x274 PF: > { %s740_s20 = sand.u32 1, %s1259_s12   ;;  %p1644_p2 = scmp.ne.s32.totalorder %s1629_s21, 0 }
 0x275   : > { %p1645_p7 = scmp.ge.s32.totalorder %s1279_s17, 2  ;;  %s741_s4 = scalar_lea.sflag [#allocation5], %s740_s20 }
 0x277   : > { %p1017_p4 = pnand %p1645_p7, %p1644_p2 }
 0x279   : > { %1254 = dma.done.wait (!%p1017_p4), %s741_s4, 2048  }
 0x27a   : > { %1256 = vsyncadd (!%p1017_p4), %s741_s4, 4294965248  ;;  %s22_s17 = sadd.s32 1, %s1279_s17   ;;  %s1646_s12 = smov %s1263_s13 }
 0x27b   : > { %p19_p8 = scmp.ge.s32.totalorder %s22_s17, 4   ;;  %s1647_s13 = smov %s1267_s14 }
 0x27c   : > { %s1648_s14 = smov %s1413_s29  ;;  %s1649_s15 = smov %s1275_s16 }
 0x27d   : > { %s1650_s16 = smov %s1652_s26  ;;  %21 = sbr.rel (!%p19_p8) target bundleno = 11 (0xb), region = 98 }
 0x284   :  { %746 = vsyncpa [#allocation4], 1 }
 0x285   :  { %748 = vsyncpa [#allocation4 + $0x1], 1 }
 0x286   :  { %749 = vsyncpa [#allocation7], 1 }
 0x287   :  { %751 = vsyncpa [#allocation7 + $0x1], 1 }
 0x288   :  { %752 = vsyncpa [#allocation5], 1 }
 0x289   :  { %754 = vsyncpa [#allocation5 + $0x1], 1 }

</bundles_post_ra>
